<compile_context>
chip_gen: v7x
topology: tpu7x:2x2x1
jax: 0.10.0
libtpu: 0.0.40
codegen_flags: <defaults>
</compile_context>

<pallas_src>
import functools

import jax
import jax.numpy as jnp
from jax.experimental import pallas as pl
from jax.experimental.pallas import tpu as pltpu

LEAKY_SLOPE = 0.2
BN_EPS = 1e-5
KH = KW = 4
STRIDE = 2
PAD = 1
LANE = 128


def _conv_stats_kernel(xm_ref, xe_ref, wb_ref, b_ref, y_ref, st_ref):
    """Fused LeakyReLU + conv(k=4,s=2,p=1) as 4 shifted matmuls + bias + BN partial sums.

    xm_ref: (TR,   Wp2, 4*C_in)   space-to-depth rows [r0, r0+TR)       (mxu dtype)
    xe_ref: (1,    Wp2, 4*C_in)   space-to-depth overlap row r0+TR      (mxu dtype)
    wb_ref: (2, 2, 4*C_in, C_pad) weight per (di, dj) tap               (mxu dtype)
    b_ref:  (1, C_pad)            conv bias                             (f32)
    y_ref:  (TR*W_out, C_pad)     pre-BN conv output tile               (f32)
    st_ref: (2, C_pad)            per-tile [sum; sum of squares]        (f32)
    """
    f32 = jnp.float32
    xm = xm_ref[...].astype(f32)
    xe = xe_ref[...].astype(f32)
    # LeakyReLU applied once to the un-duplicated slab.  LeakyReLU(0) == 0, so applying
    # it after zero padding is equivalent to activating before padding.
    xm = jnp.where(xm >= 0, xm, LEAKY_SLOPE * xm)
    xe = jnp.where(xe >= 0, xe, LEAKY_SLOPE * xe)

    tr, wp2, c4 = xm.shape
    w_out = wp2 - 1
    rows = tr * w_out
    wb = wb_ref[...]
    mxu_dt = wb.dtype

    x_lo = xm                                                     # s2d rows r0 .. r0+TR-1
    x_hi = xe if tr == 1 else jnp.concatenate([xm[1:], xe], 0)    # s2d rows r0+1 .. r0+TR

    y = b_ref[...].astype(f32)                                    # bias add in f32
    for di, src in ((0, x_lo), (1, x_hi)):
        for dj in (0, 1):
            a = src[:, dj:dj + w_out, :].reshape(rows, c4).astype(mxu_dt)
            y = y + jnp.dot(a, wb[di, dj], preferred_element_type=f32)

    y_ref[...] = y.astype(y_ref.dtype)
    # BatchNorm partials in f32 (combined outside; var clamped >= 0 there).
    st_ref[...] = jnp.concatenate(
        [jnp.sum(y, axis=0, keepdims=True),
         jnp.sum(y * y, axis=0, keepdims=True)], axis=0)


def _bn_apply_kernel(y_ref, scale_ref, shift_ref, o_ref):
    """Lane-dense elementwise BN affine: o = y * scale + shift (all f32)."""
    o_ref[...] = (y_ref[...] * scale_ref[...] + shift_ref[...]).astype(o_ref.dtype)


def _pick_row_tile(h_out, w_out, target_rows=1024):
    """Largest TR dividing h_out with (TR*w_out) % 8 == 0 and TR*w_out <= target_rows.

    target_rows=1024 keeps the per-step working set (double-buffered input slab + f32
    output tile + resident weights) at a few MiB: well inside the 32 MiB scoped-VMEM
    default and v7x's 64 MiB physical VMEM while amortizing per-grid-step overhead.
    """
    valid = [t for t in range(1, h_out + 1)
             if h_out % t == 0 and (t * w_out) % 8 == 0]
    if not valid:
        raise ValueError(f"no valid row tile for h_out={h_out}, w_out={w_out}")
    fitting = [t for t in valid if t * w_out <= target_rows]
    return max(fitting) if fitting else min(valid)


def _pad_last(a, to):
    pad = to - a.shape[-1]
    if pad == 0:
        return a
    return jnp.pad(a, [(0, 0)] * (a.ndim - 1) + [(0, pad)])


@functools.partial(jax.jit, static_argnames=("mxu_dtype", "row_tile"))
def encoder_block_forward(x, weight, bias, gamma, beta, *,
                          mxu_dtype=jnp.bfloat16, row_tile=None):
    """x: (N, C_in, H, W) NCHW.  Returns (N, C_out, H/2, W/2) NCHW float32.

    mxu_dtype: dtype fed to the MXU (bf16 recommended on v6e/v7x); statistics, bias and
    the BN affine are always f32.  row_tile: output rows per grid step (None = auto).
    """
    n, c_in, h, w = x.shape
    c_out = weight.shape[0]
    if h % 2 or w % 2:
        raise ValueError("H and W must be even for kernel=4, stride=2, padding=1")
    h_out, w_out = h // 2, w // 2
    hp2, wp2 = h_out + 1, w_out + 1          # space-to-depth spatial dims
    c4 = 4 * c_in                            # space-to-depth channels
    c_pad = -(-c_out // LANE) * LANE         # lane-dense output channels
    m_total = n * h_out * w_out

    tr = _pick_row_tile(h_out, w_out) if row_tile is None else row_tile
    if h_out % tr or (tr * w_out) % 8:
        raise ValueError(f"row_tile={tr} must divide h_out={h_out} with (tr*w_out)%8==0")
    gr = h_out // tr
    rows = tr * w_out                        # M rows per grid step

    # --- Single layout pass over the input (no im2col duplication) ---------------------
    # NCHW -> NHWC, zero-pad spatially, space-to-depth(2).
    x_nhwc = jnp.transpose(x, (0, 2, 3, 1))
    xp = jnp.pad(x_nhwc, ((0, 0), (PAD, PAD), (PAD, PAD), (0, 0)))
    x_s2d = xp.reshape(n, hp2, 2, wp2, 2, c_in)
    x_s2d = x_s2d.transpose(0, 1, 3, 2, 4, 5).reshape(n, hp2, wp2, c4)
    x_s2d = x_s2d.astype(mxu_dtype)

    # Conv weight (C_out, C_in, 4, 4) -> Wb[di, dj] of shape (4*C_in, C_pad); row order
    # (rh, rw, c) matches the space-to-depth channel packing.
    wt = jnp.transpose(weight, (2, 3, 1, 0))                       # (kh, kw, c, co)
    wb = wt.reshape(2, 2, 2, 2, c_in, c_out).transpose(0, 2, 1, 3, 4, 5)
    wb = _pad_last(wb.reshape(2, 2, c4, c_out), c_pad).astype(mxu_dtype)

    b_pad = _pad_last(bias.astype(jnp.float32)[None, :], c_pad)    # (1, C_pad)
    g_pad = _pad_last(gamma.astype(jnp.float32), c_pad)            # (C_pad,)
    be_pad = _pad_last(beta.astype(jnp.float32), c_pad)            # (C_pad,)

    # --- Pass 1: LeakyReLU + conv + bias, plus per-tile BN partial sums -----------------
    itemsize = jnp.dtype(mxu_dtype).itemsize
    cost1 = pl.CostEstimate(
        flops=2 * m_total * (KH * KW * c_in) * c_pad,
        transcendentals=0,
        bytes_accessed=int(n * hp2 * wp2 * c4 * itemsize
                           + 4 * c4 * c_pad * itemsize
                           + m_total * c_pad * 4
                           + n * gr * 2 * c_pad * 4),
    )
    y_flat, stats = pl.pallas_call(
        _conv_stats_kernel,
        grid=(n, gr),
        in_specs=[
            # Row slab [rb*TR, rb*TR+TR) of the space-to-depth input.
            pl.BlockSpec((None, tr, wp2, c4), lambda b, r: (b, r, 0, 0)),
            # One overlap row rb*TR + TR (always in range: s2d has h_out+1 rows).
            pl.BlockSpec((None, 1, wp2, c4), lambda b, r: (b, (r + 1) * tr, 0, 0)),
            # Weights / bias: constant index_map -> resident block, no re-DMA per tile.
            pl.BlockSpec((2, 2, c4, c_pad), lambda b, r: (0, 0, 0, 0)),
            pl.BlockSpec((1, c_pad), lambda b, r: (0, 0)),
        ],
        out_specs=(
            pl.BlockSpec((rows, c_pad), lambda b, r: (b * gr + r, 0)),
            pl.BlockSpec((None, None, 2, c_pad), lambda b, r: (b, r, 0, 0)),
        ),
        out_shape=(
            jax.ShapeDtypeStruct((m_total, c_pad), jnp.float32),
            jax.ShapeDtypeStruct((n, gr, 2, c_pad), jnp.float32),
        ),
        compiler_params=pltpu.CompilerParams(
            dimension_semantics=("parallel", "parallel")),
        cost_estimate=cost1,
    )(x_s2d, x_s2d, wb, b_pad)

    # --- Tiny per-channel reduction and BN scale/shift (plain JAX, f32) -----------------
    s = jnp.sum(stats, axis=(0, 1))                        # (2, C_pad)
    mean = s[0] / m_total
    var = jnp.maximum(s[1] / m_total - mean * mean, 0.0)   # f32 sums; clamp >= 0
    inv_std = jax.lax.rsqrt(var + BN_EPS)
    scale = (g_pad * inv_std)[None, :]                     # (1, C_pad)
    shift = (be_pad - mean * g_pad * inv_std)[None, :]     # (1, C_pad)

    # --- Pass 2: lane-dense elementwise BN affine ---------------------------------------
    out_flat = pl.pallas_call(
        _bn_apply_kernel,
        grid=(n * gr,),
        in_specs=[
            pl.BlockSpec((rows, c_pad), lambda i: (i, 0)),
            pl.BlockSpec((1, c_pad), lambda i: (0, 0)),
            pl.BlockSpec((1, c_pad), lambda i: (0, 0)),
        ],
        out_specs=pl.BlockSpec((rows, c_pad), lambda i: (i, 0)),
        out_shape=jax.ShapeDtypeStruct((m_total, c_pad), jnp.float32),
        compiler_params=pltpu.CompilerParams(dimension_semantics=("parallel",)),
    )(y_flat, scale, shift)

    # The kernel output is NHWC-flat with lane-dense channels; convert to NCHW only to
    # match the PyTorch module contract.
    # TODO(synk): keep NHWC end-to-end in a real pipeline to avoid this transpose pass.
    out = out_flat.reshape(n, h_out, w_out, c_pad)[..., :c_out]
    return jnp.transpose(out, (0, 3, 1, 2))


def _reference(x, weight, bias, gamma, beta):
    """Pure-JAX reference matching the PyTorch module (training-mode BatchNorm)."""
    xa = jnp.where(x >= 0, x, LEAKY_SLOPE * x)
    y = jax.lax.conv_general_dilated(
        xa, weight, window_strides=(STRIDE, STRIDE),
        padding=((PAD, PAD), (PAD, PAD)),
        dimension_numbers=("NCHW", "OIHW", "NCHW"),
        precision=jax.lax.Precision.HIGHEST,
    ) + bias[None, :, None, None]
    mean = jnp.mean(y, axis=(0, 2, 3), keepdims=True)
    var = jnp.mean((y - mean) ** 2, axis=(0, 2, 3), keepdims=True)
    return gamma[None, :, None, None] * (y - mean) * jax.lax.rsqrt(var + BN_EPS) \
        + beta[None, :, None, None]


if __name__ == "__main__":
    key = jax.random.PRNGKey(0)
    n, c_in, c_out, h, w = 2, 4, 8, 16, 16

    kx, kw_, kb = jax.random.split(key, 3)
    x = jax.random.normal(kx, (n, c_in, h, w), dtype=jnp.float32)

    # Deterministic parameter init (Conv2d-style uniform fan-in bound).
    fan_in = c_in * KH * KW
    bound = 1.0 / (fan_in ** 0.5)
    weight = jax.random.uniform(kw_, (c_out, c_in, KH, KW), jnp.float32, -bound, bound)
    bias = jax.random.uniform(kb, (c_out,), jnp.float32, -bound, bound)
    gamma = jnp.ones((c_out,), jnp.float32)   # BatchNorm2d affine init
    beta = jnp.zeros((c_out,), jnp.float32)

    ref = _reference(x, weight, bias, gamma, beta)

    # Strict-precision path: f32 MXU operands, auto row tiling.
    out_f32 = jax.block_until_ready(
        encoder_block_forward(x, weight, bias, gamma, beta, mxu_dtype=jnp.float32))
    assert out_f32.shape == (n, c_out, h // 2, w // 2), out_f32.shape
    err32 = float(jnp.max(jnp.abs(out_f32 - ref)))
    assert err32 < 2e-3, err32

    # Fast path: bf16 MXU operands (f32 stats/affine), forced multi-tile grid to exercise
    # the M-tiling + overlap-row machinery (row_tile=2 -> 4 row blocks per image).
    out_bf16 = jax.block_until_ready(
        encoder_block_forward(x, weight, bias, gamma, beta,
                              mxu_dtype=jnp.bfloat16, row_tile=2))
    assert out_bf16.shape == (n, c_out, h // 2, w // 2), out_bf16.shape
    errbf = float(jnp.max(jnp.abs(out_bf16 - ref)))
    assert errbf < 5e-2, errbf

    print("KERNEL_OK")
</pallas_src>

<mosaic_0001>
module attributes {stable_mosaic.version = 11 : i64} {
  func.func @_bn_apply_kernel(%arg0: i32, %arg1: memref<64x128xf32, #tpu.memory_space<vmem>>, %arg2: memref<1x128xf32, #tpu.memory_space<vmem>>, %arg3: memref<1x128xf32, #tpu.memory_space<vmem>>, %arg4: memref<64x128xf32, #tpu.memory_space<vmem>>) attributes {dimension_semantics = [#tpu.dimension_semantics<parallel>], iteration_bounds = array<i64: 2>, scalar_prefetch = 0 : i64, scratch_operands = 0 : i64, tpu.core_type = #tpu.core_type<tc>, window_params = [{transform_indices = @transform_0, window_bounds = array<i64: 64, 128>}, {pipeline_mode = #tpu.pipeline_mode<synchronous>, transform_indices = @transform_1, window_bounds = array<i64: 1, 128>}, {pipeline_mode = #tpu.pipeline_mode<synchronous>, transform_indices = @transform_2, window_bounds = array<i64: 1, 128>}, {transform_indices = @transform_3, window_bounds = array<i64: 64, 128>}]} {
    %c0 = arith.constant 0 : index
    %c0_0 = arith.constant 0 : index
    %0 = vector.load %arg1[%c0, %c0_0] : memref<64x128xf32, #tpu.memory_space<vmem>>, vector<64x128xf32>
    %c0_1 = arith.constant 0 : index
    %c0_2 = arith.constant 0 : index
    %1 = vector.load %arg2[%c0_1, %c0_2] : memref<1x128xf32, #tpu.memory_space<vmem>>, vector<1x128xf32>
    %2 = vector.broadcast %1 : vector<1x128xf32> to vector<64x128xf32>
    %3 = arith.mulf %0, %2 : vector<64x128xf32>
    %c0_3 = arith.constant 0 : index
    %c0_4 = arith.constant 0 : index
    %4 = vector.load %arg3[%c0_3, %c0_4] : memref<1x128xf32, #tpu.memory_space<vmem>>, vector<1x128xf32>
    %5 = vector.broadcast %4 : vector<1x128xf32> to vector<64x128xf32>
    %6 = arith.addf %3, %5 : vector<64x128xf32>
    %c0_5 = arith.constant 0 : index
    %c0_6 = arith.constant 0 : index
    %7 = vector.load %arg4[%c0_5, %c0_6] : memref<64x128xf32, #tpu.memory_space<vmem>>, vector<64x128xf32>
    tpu.vector_store %arg4[%c0_5, %c0_6], %6 {strides = array<i32>} : memref<64x128xf32, #tpu.memory_space<vmem>>, vector<64x128xf32>,
    return
  }
  func.func @transform_0(%arg0: i32) -> (i32, i32) {
    %c0_i32 = arith.constant 0 : i32
    %c0_i32_0 = arith.constant 0 : i32
    return %arg0, %c0_i32 : i32, i32
  }
  func.func @transform_1(%arg0: i32) -> (i32, i32) {
    %c0_i32 = arith.constant 0 : i32
    %c0_i32_0 = arith.constant 0 : i32
    %c0_i32_1 = arith.constant 0 : i32
    return %c0_i32, %c0_i32_0 : i32, i32
  }
  func.func @transform_2(%arg0: i32) -> (i32, i32) {
    %c0_i32 = arith.constant 0 : i32
    %c0_i32_0 = arith.constant 0 : i32
    %c0_i32_1 = arith.constant 0 : i32
    return %c0_i32, %c0_i32_0 : i32, i32
  }
  func.func @transform_3(%arg0: i32) -> (i32, i32) {
    %c0_i32 = arith.constant 0 : i32
    %c0_i32_0 = arith.constant 0 : i32
    return %arg0, %c0_i32 : i32, i32
  }
}

module attributes {stable_mosaic.version = 11 : i64} {
  func.func @_conv_stats_kernel(%arg0: i32, %arg1: i32, %arg2: memref<1x8x9x16xf32, #tpu.memory_space<vmem>>, %arg3: memref<1x1x9x16xf32, #tpu.memory_space<vmem>>, %arg4: memref<2x2x16x128xf32, #tpu.memory_space<vmem>>, %arg5: memref<1x128xf32, #tpu.memory_space<vmem>>, %arg6: memref<64x128xf32, #tpu.memory_space<vmem>>, %arg7: memref<1x1x2x128xf32, #tpu.memory_space<vmem>>) attributes {dimension_semantics = [#tpu.dimension_semantics<parallel>, #tpu.dimension_semantics<parallel>], iteration_bounds = array<i64: 2, 1>, scalar_prefetch = 0 : i64, scratch_operands = 0 : i64, tpu.core_type = #tpu.core_type<tc>, window_params = [{transform_indices = @transform_0, window_bounds = array<i64: 1, 8, 9, 16>}, {transform_indices = @transform_1, window_bounds = array<i64: 1, 1, 9, 16>}, {pipeline_mode = #tpu.pipeline_mode<synchronous>, transform_indices = @transform_2, window_bounds = array<i64: 2, 2, 16, 128>}, {pipeline_mode = #tpu.pipeline_mode<synchronous>, transform_indices = @transform_3, window_bounds = array<i64: 1, 128>}, {transform_indices = @transform_4, window_bounds = array<i64: 64, 128>}, {transform_indices = @transform_5, window_bounds = array<i64: 1, 1, 2, 128>}]} {
    %c0 = arith.constant 0 : index
    %c0_0 = arith.constant 0 : index
    %c0_1 = arith.constant 0 : index
    %c0_2 = arith.constant 0 : index
    %0 = vector.load %arg2[%c0, %c0_0, %c0_1, %c0_2] : memref<1x8x9x16xf32, #tpu.memory_space<vmem>>, vector<1x8x9x16xf32>
    %1 = vector.shape_cast %0 : vector<1x8x9x16xf32> to vector<8x9x16xf32>
    %c0_3 = arith.constant 0 : index
    %c0_4 = arith.constant 0 : index
    %c0_5 = arith.constant 0 : index
    %c0_6 = arith.constant 0 : index
    %2 = vector.load %arg3[%c0_3, %c0_4, %c0_5, %c0_6] : memref<1x1x9x16xf32, #tpu.memory_space<vmem>>, vector<1x1x9x16xf32>
    %3 = vector.shape_cast %2 : vector<1x1x9x16xf32> to vector<1x9x16xf32>
    %cst = arith.constant 0.000000e+00 : f32
    %4 = vector.broadcast %cst : f32 to vector<8x9x16xf32>
    %5 = arith.cmpf oge, %1, %4 : vector<8x9x16xf32>
    %cst_7 = arith.constant 2.000000e-01 : f32
    %6 = vector.broadcast %cst_7 : f32 to vector<8x9x16xf32>
    %7 = arith.mulf %6, %1 : vector<8x9x16xf32>
    %8 = arith.select %5, %1, %7 : vector<8x9x16xi1>, vector<8x9x16xf32>
    %cst_8 = arith.constant 0.000000e+00 : f32
    %9 = vector.broadcast %cst_8 : f32 to vector<1x9x16xf32>
    %10 = arith.cmpf oge, %3, %9 : vector<1x9x16xf32>
    %cst_9 = arith.constant 2.000000e-01 : f32
    %11 = vector.broadcast %cst_9 : f32 to vector<1x9x16xf32>
    %12 = arith.mulf %11, %3 : vector<1x9x16xf32>
    %13 = arith.select %10, %3, %12 : vector<1x9x16xi1>, vector<1x9x16xf32>
    %c0_10 = arith.constant 0 : index
    %c0_11 = arith.constant 0 : index
    %c0_12 = arith.constant 0 : index
    %c0_13 = arith.constant 0 : index
    %14 = vector.load %arg4[%c0_10, %c0_11, %c0_12, %c0_13] : memref<2x2x16x128xf32, #tpu.memory_space<vmem>>, vector<2x2x16x128xf32>
    %15 = vector.extract_strided_slice %8 {offsets = [1, 0, 0], sizes = [7, 9, 16], strides = [1, 1, 1]} : vector<8x9x16xf32> to vector<7x9x16xf32>
    %16 = tpu.concatenate %15, %13 in 0 : vector<7x9x16xf32>, vector<1x9x16xf32> -> vector<8x9x16xf32>
    %c0_14 = arith.constant 0 : index
    %c0_15 = arith.constant 0 : index
    %17 = vector.load %arg5[%c0_14, %c0_15] : memref<1x128xf32, #tpu.memory_space<vmem>>, vector<1x128xf32>
    %18 = vector.extract_strided_slice %8 {offsets = [0, 0, 0], sizes = [8, 8, 16], strides = [1, 1, 1]} : vector<8x9x16xf32> to vector<8x8x16xf32>
    %19 = vector.shape_cast %18 : vector<8x8x16xf32> to vector<64x16xf32>
    %20 = vector.extract_strided_slice %14 {offsets = [0, 0, 0, 0], sizes = [1, 1, 16, 128], strides = [1, 1, 1, 1]} : vector<2x2x16x128xf32> to vector<1x1x16x128xf32>
    %21 = vector.shape_cast %20 : vector<1x1x16x128xf32> to vector<16x128xf32>
    %cst_16 = arith.constant dense<0.000000e+00> : vector<64x128xf32>
    %22 = tpu.matmul %19, %21, %cst_16 {dimension_numbers = #tpu.dot_dimension_numbers<[1], [0], [0], [1], [0, 0, 1, 1], [], []>} : vector<64x16xf32>, vector<16x128xf32>, vector<64x128xf32> -> vector<64x128xf32>
    %23 = vector.broadcast %17 : vector<1x128xf32> to vector<64x128xf32>
    %24 = arith.addf %23, %22 : vector<64x128xf32>
    %25 = vector.extract_strided_slice %8 {offsets = [0, 1, 0], sizes = [8, 8, 16], strides = [1, 1, 1]} : vector<8x9x16xf32> to vector<8x8x16xf32>
    %26 = vector.shape_cast %25 : vector<8x8x16xf32> to vector<64x16xf32>
    %27 = vector.extract_strided_slice %14 {offsets = [0, 1, 0, 0], sizes = [1, 1, 16, 128], strides = [1, 1, 1, 1]} : vector<2x2x16x128xf32> to vector<1x1x16x128xf32>
    %28 = vector.shape_cast %27 : vector<1x1x16x128xf32> to vector<16x128xf32>
    %cst_17 = arith.constant dense<0.000000e+00> : vector<64x128xf32>
    %29 = tpu.matmul %26, %28, %cst_17 {dimension_numbers = #tpu.dot_dimension_numbers<[1], [0], [0], [1], [0, 0, 1, 1], [], []>} : vector<64x16xf32>, vector<16x128xf32>, vector<64x128xf32> -> vector<64x128xf32>
    %30 = arith.addf %24, %29 : vector<64x128xf32>
    %31 = vector.extract_strided_slice %16 {offsets = [0, 0, 0], sizes = [8, 8, 16], strides = [1, 1, 1]} : vector<8x9x16xf32> to vector<8x8x16xf32>
    %32 = vector.shape_cast %31 : vector<8x8x16xf32> to vector<64x16xf32>
    %33 = vector.extract_strided_slice %14 {offsets = [1, 0, 0, 0], sizes = [1, 1, 16, 128], strides = [1, 1, 1, 1]} : vector<2x2x16x128xf32> to vector<1x1x16x128xf32>
    %34 = vector.shape_cast %33 : vector<1x1x16x128xf32> to vector<16x128xf32>
    %cst_18 = arith.constant dense<0.000000e+00> : vector<64x128xf32>
    %35 = tpu.matmul %32, %34, %cst_18 {dimension_numbers = #tpu.dot_dimension_numbers<[1], [0], [0], [1], [0, 0, 1, 1], [], []>} : vector<64x16xf32>, vector<16x128xf32>, vector<64x128xf32> -> vector<64x128xf32>
    %36 = arith.addf %30, %35 : vector<64x128xf32>
    %37 = vector.extract_strided_slice %16 {offsets = [0, 1, 0], sizes = [8, 8, 16], strides = [1, 1, 1]} : vector<8x9x16xf32> to vector<8x8x16xf32>
    %38 = vector.shape_cast %37 : vector<8x8x16xf32> to vector<64x16xf32>
    %39 = vector.extract_strided_slice %14 {offsets = [1, 1, 0, 0], sizes = [1, 1, 16, 128], strides = [1, 1, 1, 1]} : vector<2x2x16x128xf32> to vector<1x1x16x128xf32>
    %40 = vector.shape_cast %39 : vector<1x1x16x128xf32> to vector<16x128xf32>
    %cst_19 = arith.constant dense<0.000000e+00> : vector<64x128xf32>
    %41 = tpu.matmul %38, %40, %cst_19 {dimension_numbers = #tpu.dot_dimension_numbers<[1], [0], [0], [1], [0, 0, 1, 1], [], []>} : vector<64x16xf32>, vector<16x128xf32>, vector<64x128xf32> -> vector<64x128xf32>
    %42 = arith.addf %36, %41 : vector<64x128xf32>
    %c0_20 = arith.constant 0 : index
    %c0_21 = arith.constant 0 : index
    %43 = vector.load %arg6[%c0_20, %c0_21] : memref<64x128xf32, #tpu.memory_space<vmem>>, vector<64x128xf32>
    tpu.vector_store %arg6[%c0_20, %c0_21], %42 {strides = array<i32>} : memref<64x128xf32, #tpu.memory_space<vmem>>, vector<64x128xf32>,
    %cst_22 = arith.constant dense<0.000000e+00> : vector<128xf32>
    %44 = vector.multi_reduction <add>, %42, %cst_22 [0] : vector<64x128xf32> to vector<128xf32>
    %45 = vector.shape_cast %44 : vector<128xf32> to vector<1x128xf32>
    %46 = arith.mulf %42, %42 : vector<64x128xf32>
    %cst_23 = arith.constant dense<0.000000e+00> : vector<128xf32>
    %47 = vector.multi_reduction <add>, %46, %cst_23 [0] : vector<64x128xf32> to vector<128xf32>
    %48 = vector.shape_cast %47 : vector<128xf32> to vector<1x128xf32>
    %49 = tpu.concatenate %45, %48 in 0 : vector<1x128xf32>, vector<1x128xf32> -> vector<2x128xf32>
    %c0_24 = arith.constant 0 : index
    %c0_25 = arith.constant 0 : index
    %c0_26 = arith.constant 0 : index
    %c0_27 = arith.constant 0 : index
    %50 = vector.load %arg7[%c0_24, %c0_25, %c0_26, %c0_27] : memref<1x1x2x128xf32, #tpu.memory_space<vmem>>, vector<1x1x2x128xf32>
    %51 = vector.shape_cast %50 : vector<1x1x2x128xf32> to vector<2x128xf32>
    %52 = vector.shape_cast %49 : vector<2x128xf32> to vector<1x1x2x128xf32>
    tpu.vector_store %arg7[%c0_24, %c0_25, %c0_26, %c0_27], %52 {strides = array<i32>} : memref<1x1x2x128xf32, #tpu.memory_space<vmem>>, vector<1x1x2x128xf32>,
    return
  }
  func.func @transform_0(%arg0: i32, %arg1: i32) -> (i32, i32, i32, i32) {
    %c0_i32 = arith.constant 0 : i32
    %c0_i32_0 = arith.constant 0 : i32
    %c0_i32_1 = arith.constant 0 : i32
    return %arg0, %arg1, %c0_i32, %c0_i32_0 : i32, i32, i32, i32
  }
  func.func @transform_1(%arg0: i32, %arg1: i32) -> (i32, i32, i32, i32) {
    %c1_i32 = arith.constant 1 : i32
    %0 = arith.addi %arg1, %c1_i32 : i32
    %c8_i32 = arith.constant 8 : i32
    %1 = arith.muli %0, %c8_i32 : i32
    %c0_i32 = arith.constant 0 : i32
    %c0_i32_0 = arith.constant 0 : i32
    %c0_i32_1 = arith.constant 0 : i32
    return %arg0, %1, %c0_i32, %c0_i32_0 : i32, i32, i32, i32
  }
  func.func @transform_2(%arg0: i32, %arg1: i32) -> (i32, i32, i32, i32) {
    %c0_i32 = arith.constant 0 : i32
    %c0_i32_0 = arith.constant 0 : i32
    %c0_i32_1 = arith.constant 0 : i32
    %c0_i32_2 = arith.constant 0 : i32
    %c0_i32_3 = arith.constant 0 : i32
    return %c0_i32, %c0_i32_0, %c0_i32_1, %c0_i32_2 : i32, i32, i32, i32
  }
  func.func @transform_3(%arg0: i32, %arg1: i32) -> (i32, i32) {
    %c0_i32 = arith.constant 0 : i32
    %c0_i32_0 = arith.constant 0 : i32
    %c0_i32_1 = arith.constant 0 : i32
    return %c0_i32, %c0_i32_0 : i32, i32
  }
  func.func @transform_4(%arg0: i32, %arg1: i32) -> (i32, i32) {
    %c1_i32 = arith.constant 1 : i32
    %0 = arith.muli %arg0, %c1_i32 : i32
    %1 = arith.addi %0, %arg1 : i32
    %c0_i32 = arith.constant 0 : i32
    %c0_i32_0 = arith.constant 0 : i32
    return %1, %c0_i32 : i32, i32
  }
  func.func @transform_5(%arg0: i32, %arg1: i32) -> (i32, i32, i32, i32) {
    %c0_i32 = arith.constant 0 : i32
    %c0_i32_0 = arith.constant 0 : i32
    %c0_i32_1 = arith.constant 0 : i32
    return %arg0, %arg1, %c0_i32, %c0_i32_0 : i32, i32, i32, i32
  }
}

</mosaic_0001>

<bundles_post_ra>
// kernel: encoder_block_forward.3
= control target key start
LH: loop header
LB: loop body
LE: loop exit
PB: predicated region body
PF: predicated region fallthrough
CT: control target
= control target key end

     0   :  { %s325_s12 = smov 0   ;;  %s348_s0 = inlined_call_operand.vmem [shape: f32[128,128], index: 0, kind: input, shape index: {}]   ;;  %s349_s1 = inlined_call_operand.vmem [shape: f32[1,128], index: 1, kind: input, shape index: {}]   ;;  %s350_s2 = inlined_call_operand.vmem [shape: f32[1,128], index: 2, kind: input, shape index: {}]   ;;  %s351_s3 = inlined_call_operand.vmem [shape: f32[128,128], index: 3, kind: output, shape index: {}]  }
   0x1 LB: > { %s276_s13 = sadd.s32 4294967295, %s303_s12   ;;  %p280_p0 = scmp.ge.s32.totalorder %s303_s12, 1  ;;  %s303_s12 = sphi %s325_s12, %s13_s12  }
   0x2   : > { %p138_p1 = scmp.lt.s32.totalorder %s303_s12, 3 }
   0x4   : > { %p139_p2 = pnand %p280_p0, %p138_p1 }
   0x5   : > { %s281_s14 = sshll.u32 (!%p139_p2), %s276_s13, 3  ;;  %v285_v0 = vld [vmem:[%s349_s1] ss:$0 sm:$0xff] (!%p139_p2) }
   0x6   : > { %142 = sbr.rel (%p139_p2) target bundleno = 25 (0x19), region = 32  ;;  %p163_p3 = scmp.lt.s32.totalorder (!%p139_p2), %s281_s14, 15  ;;  %v286_v1 = vld [vmem:[%s350_s2] ss:$0 sm:$0xff] (!%p139_p2) }
   0xd   : > { %s353_s14 = smov (!%p163_p3, %s281_s14), 15 }
   0xe   : > { %s282_s15 = sshll.u32 %s353_s14, 3 }
   0xf   : > { %s166_s20 = scalar_lea.vmem %s348_s0, %s282_s15  ;;  %s172_s25 = scalar_lea.vmem %s351_s3, %s282_s15 }
  0x10   : > { %v174_v2 = vld [vmem:[%s166_s20] sm:$0xff]  ;;  %v175_v3 = vld [vmem:[%s166_s20 + $0x8] sm:$0xff]  ;;  %v176_v4 = vld [vmem:[%s166_s20 + $0x10] sm:$0xff] }
  0x11   : > { %v189_v5 = vmul.f32 %v285_v0, %v174_v2  ;;  %v190_v6 = vmul.f32 %v285_v0, %v175_v3  ;;  %v191_v7 = vmul.f32 %v285_v0, %v176_v4  ;;  %v177_v8 = vld [vmem:[%s166_s20 + $0x18] sm:$0xff]  ;;  %v178_v9 = vld [vmem:[%s166_s20 + $0x20] sm:$0xff]  ;;  %v179_v10 = vld [vmem:[%s166_s20 + $0x28] sm:$0xff] }
  0x12   : > { %v192_v11 = vmul.f32 %v285_v0, %v177_v8  ;;  %v193_v12 = vmul.f32 %v285_v0, %v178_v9  ;;  %v194_v13 = vmul.f32 %v285_v0, %v179_v10  ;;  %v180_v14 = vld [vmem:[%s166_s20 + $0x30] sm:$0xff]  ;;  %v181_v15 = vld [vmem:[%s166_s20 + $0x38] sm:$0xff] }
  0x13   : > { %v204_v16 = vadd.f32 %v286_v1, %v189_v5  ;;  %v205_v17 = vadd.f32 %v286_v1, %v190_v6  ;;  %v206_v18 = vadd.f32 %v286_v1, %v191_v7  ;;  %v195_v19 = vmul.f32 %v285_v0, %v180_v14 }
  0x14   : > { %v207_v20 = vadd.f32 %v286_v1, %v192_v11  ;;  %v208_v21 = vadd.f32 %v286_v1, %v193_v12  ;;  %v209_v22 = vadd.f32 %v286_v1, %v194_v13  ;;  %v196_v23 = vmul.f32 %v285_v0, %v181_v15 }
  0x15   : > { %212 = vst [vmem:[%s172_s25] sm:$0xff] %v204_v16  ;;  %213 = vst [vmem:[%s172_s25 + $0x8] sm:$0xff] %v205_v17  ;;  %v210_v24 = vadd.f32 %v286_v1, %v195_v19 }
  0x16   : > { %214 = vst [vmem:[%s172_s25 + $0x10] sm:$0xff] %v206_v18  ;;  %215 = vst [vmem:[%s172_s25 + $0x18] sm:$0xff] %v207_v20  ;;  %v211_v25 = vadd.f32 %v286_v1, %v196_v23 }
  0x17   : > { %216 = vst [vmem:[%s172_s25 + $0x20] sm:$0xff] %v208_v21  ;;  %217 = vst [vmem:[%s172_s25 + $0x28] sm:$0xff] %v209_v22 }
  0x18   : > { %218 = vst [vmem:[%s172_s25 + $0x30] sm:$0xff] %v210_v24  ;;  %219 = vst [vmem:[%s172_s25 + $0x38] sm:$0xff] %v211_v25 }
  0x19 PF: > { %s13_s12 = sadd.s32 1, %s303_s12  }
  0x1a   : > { %p10_p4 = scmp.ge.s32.totalorder %s13_s12, 4  }
  0x1c   :  { %12 = sbr.rel (!%p10_p4) target bundleno = 1 (0x1), region = 62 }

// kernel: encoder_block_forward.2
= control target key start
LH: loop header
LB: loop body
LE: loop exit
PB: predicated region body
PF: predicated region fallthrough
CT: control target
= control target key end

     0   :  { %s1440_s18 = smov 0   ;;  %s1442_s19 = smov 0   ;;  %s1638_s0 = inlined_call_operand.vmem [shape: f32[2,9,9,16], index: 0, kind: input, shape index: {}, may-alias: {0,1}]   ;;  %s1639_s1 = inlined_call_operand.vmem [shape: f32[2,9,9,16], index: 1, kind: input, shape index: {}, may-alias: {0,1}]   ;;  %s1640_s2 = inlined_call_operand.vmem [shape: f32[2,2,16,128], index: 2, kind: input, shape index: {}]   ;;  %s1641_s3 = inlined_call_operand.vmem [shape: f32[1,128], index: 3, kind: input, shape index: {}]   ;;  %s1642_s4 = inlined_call_operand.vmem [shape: f32[128,128], index: 4, kind: output, shape index: {0}]   ;;  %s1643_s5 = inlined_call_operand.vmem [shape: f32[2,1,2,128], index: 5, kind: output, shape index: {1}]  }
   0x1   :  { %s1444_s20 = smov 0  }
   0x2 LB: > { %s28_s21 = sadd.s32 1, %s1404_s19  ;;  %p1164_p0 = scmp.ge.s32.totalorder %s1408_s20, 1  ;;  %s1408_s20 = sphi %s1444_s20, %s16_s20   ;;  %s1404_s19 = sphi %s1442_s19, %s1645_s19   ;;  %s1400_s18 = sphi %s1440_s18, %s1644_s18  }
   0x3   : > { %p30_p1 = scmp.ge.s32.totalorder %s28_s21, 2  ;;  %p248_p2 = scmp.lt.s32.totalorder %s1408_s20, 3 }
   0x5   : > { %s1647_s21 = smov (%p30_p1, %s28_s21), 0  ;;  %p249_p3 = pnand %p1164_p0, %p248_p2 }
   0x6   : > { %v426_v0 = vld [vmem:[%s1640_s2] sm:$0xff] (!%p249_p3)  ;;  %v427_v1 = vld [vmem:[%s1640_s2 + $0x8] sm:$0xff] (!%p249_p3)  ;;  %p311_p4 = scmp.lt.s32.totalorder (!%p249_p3), %s1400_s18, 1  ;;  %v428_v5 = vld [vmem:[%s1640_s2 + $0x10] sm:$0xff] (!%p249_p3)  ;;  %vm435_vm0 = vcmask (!%p249_p3), 130048   ;;  %vm587_vm7 = vcmask (!%p249_p3), 1046528  }
   0x7   : > { %252 = sbr.rel (%p249_p3) target bundleno = 289 (0x121), region = 36  ;;  %v430_v2 = vld [vmem:[%s1640_s2 + $0x20] sm:$0xff] (!%p249_p3)  ;;  %v1311_v3 = vpack.c.bf16 (!%p249_p3), %v427_v1, %v426_v0  ;;  %v431_v4 = vld [vmem:[%s1640_s2 + $0x28] sm:$0xff] (!%p249_p3)  ;;  %v429_v6 = vld [vmem:[%s1640_s2 + $0x18] sm:$0xff] (!%p249_p3)  ;;  %s1167_s26 = sshll.u32 (!%p249_p3), %s1400_s18, 3 }
   0x8   : > { %v1319_v7 = vpack.c.bf16 (!%p249_p3), %v431_v4, %v430_v2  ;;  %v1315_v8 = vpack.c.bf16 (!%p249_p3), %v429_v6, %v428_v5  ;;  %v432_v9 = vld [vmem:[%s1640_s2 + $0x30] sm:$0xff] (!%p249_p3)  ;;  %v433_v10 = vld [vmem:[%s1640_s2 + $0x38] sm:$0xff] (!%p249_p3)  ;;  %p341_p5 = scmp.lt.s32.totalorder (!%p249_p3), %s1167_s26, 15 }
   0x9   : > { %1312 = vmatprep.subr.bf16.mxu1 (!%p249_p3), %v1311_v3  ;;  %v1323_v11 = vpack.c.bf16 (!%p249_p3), %v433_v10, %v432_v9 }
   0xa   : > { %1314 = vmatpush3.bf16.msra.mxu1 (!%p249_p3), %v1311_v3  ;;  %1320 = vmatprep.subr.bf16.mxu0 (!%p249_p3), %v1319_v7 }
   0xb   : > { %1322 = vmatpush3.bf16.msra.mxu0 (!%p249_p3), %v1319_v7  ;;  %1316 = vmatprep.subr.bf16.mxu1 (!%p249_p3), %v1315_v8 }
   0xc   : > { %1324 = vmatprep.subr.bf16.mxu0 (!%p249_p3), %v1323_v11 }
   0xe   : > { %s1480_s9 = scalar_select %p311_p4, %s1400_s18, 1 }
   0xf   : > { %s1649_s26 = smov (!%p341_p5, %s1167_s26), 15 }
  0x10   : > { %s1359_s14 = smul.u32 144, %s1480_s9  ;;  %s1168_s29 = sshll.u32 %s1649_s26, 3 }
  0x11   : > { %s1615_s7 = scalar_lea.vmem %s1642_s4, %s1168_s29  ;;  %s1169_s18 = sshll.u32 %s1480_s9, 1 }
  0x12   : > { %s1492_s17 = scalar_lea.vmem %s1638_s0, %s1359_s14  ;;  %s1206_s22 = sadd.s32 128, %s1359_s14 }
  0x13   : > { %v354_v12 = vld [vmem:[%s1492_s17] sm:$0xff]  ;;  %v356_v13 = vld [vmem:[%s1492_s17 + $0x10] sm:$0xff]  ;;  %s1508_s25 = scalar_lea.vmem %s1639_s1, %s1206_s22  ;;  %v355_v35 = vld [vmem:[%s1492_s17 + $0x8] sm:$0x1]  ;;  %s353_s11 = scalar_lea.vmem %s1643_s5, %s1169_s18 }
  0x14   : > { %v358_v14 = vld [vmem:[%s1492_s17 + $0x20] sm:$0xff]  ;;  %vm372_vm1 = vcmp.ge.f32.partialorder %v354_v12, 0.0  ;;  %v388_v15 = vmul.f32 0.2, %v354_v12  ;;  %vm374_vm2 = vcmp.ge.f32.partialorder %v356_v13, 0.0  ;;  %v360_v18 = vld [vmem:[%s1492_s17 + $0x30] sm:$0xff] }
  0x15   : > { %v390_v16 = vmul.f32 0.2, %v356_v13  ;;  %vm376_vm3 = vcmp.ge.f32.partialorder %v358_v14, 0.0  ;;  %v392_v17 = vmul.f32 0.2, %v358_v14  ;;  %v362_v19 = vld [vmem:[%s1492_s17 + $0x40] sm:$0xff] }
  0x16   : > { %v364_v20 = vld [vmem:[%s1492_s17 + $0x50] sm:$0xff]  ;;  %v1500_v21 = vsel %vm372_vm1, %v354_v12, %v388_v15  ;;  %vm378_vm4 = vcmp.ge.f32.partialorder %v360_v18, 0.0  ;;  %v394_v23 = vmul.f32 0.2, %v360_v18  ;;  %v366_v24 = vld [vmem:[%s1492_s17 + $0x60] sm:$0xff]  ;;  %vm380_vm5 = vcmp.ge.f32.partialorder %v362_v19, 0.0 }
  0x17   : > { %v1502_v22 = vsel %vm374_vm2, %v356_v13, %v390_v16  ;;  %1251 = vmatprep.mubr.msk.f32.mxu1 %vm435_vm0, %v1500_v21  ;;  %v1514_v25 = vsel %vm376_vm3, %v358_v14, %v392_v17  ;;  %v368_v26 = vld [vmem:[%s1492_s17 + $0x70] sm:$0xff]  ;;  %v396_v28 = vmul.f32 0.2, %v362_v19  ;;  %vm382_vm6 = vcmp.ge.f32.partialorder %v364_v20, 0.0  ;;  %v370_v31 = vld [vmem:[%s1508_s25] sm:$0xff] }
  0x18   : > { %1283 = vmatprep.mubr.msk.f32.mxu0 %vm435_vm0, %v1502_v22  ;;  %1252 = vmatmul.mubr.msk.f32.vlgmr.msra.gmra.mrb[0].mxu1 %vm435_vm0, %v1502_v22  ;;  %v1521_v27 = vsel %vm378_vm4, %v360_v18, %v394_v23  ;;  %v398_v29 = vmul.f32 0.2, %v364_v20  ;;  %v400_v30 = vmul.f32 0.2, %v366_v24  ;;  %v588_v32 = vrot.slane %v1500_v21, 1 }
  0x19   : > { %1284 = vmatmul.mubr.msk.f32.vlgmr.msra.gmra.mrb[0].mxu0 %vm435_vm0, %v1514_v25  ;;  %1318 = vmatpush3.bf16.msra.mxu1 %v1315_v8  ;;  %v1530_v33 = vsel %vm380_vm5, %v362_v19, %v396_v28  ;;  %vm384_vm8 = vcmp.ge.f32.partialorder %v366_v24, 0.0  ;;  %v402_v34 = vmul.f32 0.2, %v368_v26  ;;  %v591_v36 = vrot.slane %v1502_v22, 1  ;;  %v357_v38 = vld [vmem:[%s1492_s17 + $0x18] sm:$0x1] }
  0x1a   : > { %1326 = vmatpush3.bf16.msra.mxu0 %v1323_v11  ;;  %1254 = vmatprep.mubr.msk.f32.mxu1 %vm435_vm0, %v1514_v25  ;;  %v1534_v37 = vsel %vm382_vm6, %v364_v20, %v398_v29  ;;  %vm386_vm9 = vcmp.ge.f32.partialorder %v368_v26, 0.0  ;;  %v359_v39 = vld [vmem:[%s1492_s17 + $0x28] sm:$0x1]  ;;  %v594_v40 = vrot.slane %v1514_v25, 1  ;;  %vm420_vm10 = vcmp.ge.f32.partialorder %v370_v31, 0.0 }
  0x1b   : > { %1286 = vmatprep.mubr.msk.f32.mxu0 %vm435_vm0, %v1521_v27  ;;  %v422_v41 = vmul.f32 0.2, %v370_v31  ;;  %v361_v42 = vld [vmem:[%s1492_s17 + $0x38] sm:$0x1]  ;;  %v597_v43 = vrot.slane %v1521_v27, 1  ;;  %v1550_v44 = vsel %vm384_vm8, %v366_v24, %v400_v30  ;;  %vm373_vm11 = vcmp.ge.f32.partialorder %v355_v35, 0.0 }
  0x1c   : > { %1255 = vmatmul.mubr.msk.f32.gmra.mrb[2].mxu1 %vm435_vm0, %v1521_v27  ;;  %v389_v45 = vmul.f32 0.2, %v355_v35  ;;  %v363_v46 = vld [vmem:[%s1492_s17 + $0x48] sm:$0x1]  ;;  %v1554_v47 = vsel %vm386_vm9, %v368_v26, %v402_v34  ;;  %vm375_vm12 = vcmp.ge.f32.partialorder %v357_v38, 0.0  ;;  %vm377_vm13 = vcmp.ge.f32.partialorder %v359_v39, 0.0 }
  0x1d   : > { %1287 = vmatmul.mubr.msk.f32.gmra.mrb[2].mxu0 %vm435_vm0, %v1530_v33  ;;  %1257 = vmatprep.mubr.msk.f32.mxu1 %vm435_vm0, %v1530_v33  ;;  %v391_v48 = vmul.f32 0.2, %v357_v38  ;;  %v365_v49 = vld [vmem:[%s1492_s17 + $0x58] sm:$0x1]  ;;  %v1557_v50 = vsel %vm420_vm10, %v370_v31, %v422_v41  ;;  %v393_v52 = vmul.f32 0.2, %v359_v39 }
  0x1e   : > { %1289 = vmatprep.mubr.msk.f32.mxu0 %vm435_vm0, %v1534_v37  ;;  %v405_v51 = vsel %vm373_vm11, %v355_v35, %v389_v45  ;;  %vm379_vm14 = vcmp.ge.f32.partialorder %v361_v42, 0.0  ;;  %v395_v55 = vmul.f32 0.2, %v361_v42  ;;  %vm381_vm15 = vcmp.ge.f32.partialorder %v363_v46, 0.0  ;;  %v367_v56 = vld [vmem:[%s1492_s17 + $0x68] sm:$0x1] }
  0x1f   : > { %v589_v53 = vrot.slane %v405_v51, 1  ;;  %v407_v54 = vsel %vm375_vm12, %v357_v38, %v391_v48  ;;  %v409_v58 = vsel %vm377_vm13, %v359_v39, %v393_v52  ;;  %v397_v59 = vmul.f32 0.2, %v363_v46  ;;  %v369_v0 = vld [vmem:[%s1492_s17 + $0x78] sm:$0x1] }
  0x20   : > { %1258 = vmatmul.mubr.msk.f32.gmra.mrb[4].mxu1 %vm435_vm0, %v1534_v37  ;;  %v592_v57 = vrot.slane %v407_v54, 1  ;;  %vm383_vm1 = vcmp.ge.f32.partialorder %v365_v49, 0.0  ;;  %v595_v61 = vrot.slane %v409_v58, 1  ;;  %v411_v62 = vsel %vm379_vm14, %v361_v42, %v395_v55  ;;  %v371_v1 = vld [vmem:[%s1508_s25 + $0x8] sm:$0x1] }
  0x21   : > { %1290 = vmatmul.mubr.msk.f32.gmra.mrb[4].mxu0 %vm435_vm0, %v1550_v44  ;;  %1260 = vmatprep.mubr.msk.f32.mxu1 %vm435_vm0, %v1550_v44  ;;  %v590_v60 = vsel %vm587_vm7, %v588_v32, %v589_v53  ;;  %v399_v63 = vmul.f32 0.2, %v365_v49  ;;  %v598_v3 = vrot.slane %v411_v62, 1  ;;  %v413_v4 = vsel %vm381_vm15, %v363_v46, %v397_v59  ;;  %v1178_v29 = vld [vmem:[%s1641_s3] ss:$0 sm:$0xff] }
  0x22   : > { %1292 = vmatprep.mubr.msk.f32.mxu0 %vm435_vm0, %v1554_v47  ;;  %v593_v2 = vsel %vm587_vm7, %v591_v36, %v592_v57  ;;  %vm385_vm2 = vcmp.ge.f32.partialorder %v367_v56, 0.0  ;;  %v600_v5 = vrot.slane %v1530_v33, 1  ;;  %v603_v6 = vrot.slane %v1534_v37, 1 }
  0x23   : > { %v415_v7 = vsel %vm383_vm1, %v365_v49, %v399_v63  ;;  %v401_v8 = vmul.f32 0.2, %v367_v56  ;;  %v596_v9 = vsel %vm587_vm7, %v594_v40, %v595_v61  ;;  %v601_v10 = vrot.slane %v413_v4, 1 }
  0x24   : > { %1261 = vmatmul.mubr.msk.f32.gmra.mrb[6].mxu1 %vm435_vm0, %v1554_v47  ;;  %vm387_vm3 = vcmp.ge.f32.partialorder %v369_v0, 0.0  ;;  %v403_v11 = vmul.f32 0.2, %v369_v0  ;;  %v423_v12 = vmul.f32 0.2, %v371_v1  ;;  %v599_v13 = vsel %vm587_vm7, %v597_v43, %v598_v3 }
  0x25   : > { %1293 = vmatmul.mubr.msk.f32.gmra.mrb[6].mxu0 %vm435_vm0, %v1557_v50  ;;  %1267 = vmatprep.mubr.msk.f32.mxu1 %vm435_vm0, %v590_v60  ;;  %v604_v14 = vrot.slane %v415_v7, 1  ;;  %v417_v15 = vsel %vm385_vm2, %v367_v56, %v401_v8  ;;  %vm421_vm4 = vcmp.ge.f32.partialorder %v371_v1, 0.0  ;;  %v606_v17 = vrot.slane %v1550_v44, 1 }
  0x26   : > { %1299 = vmatprep.mubr.msk.f32.mxu0 %vm435_vm0, %v593_v2  ;;  %v419_v16 = vsel %vm387_vm3, %v369_v0, %v403_v11  ;;  %v602_v18 = vsel %vm587_vm7, %v600_v5, %v601_v10  ;;  %v607_v19 = vrot.slane %v417_v15, 1  ;;  %v609_v20 = vrot.slane %v1554_v47, 1 }
  0x27   : > { %v605_v21 = vsel %vm587_vm7, %v603_v6, %v604_v14  ;;  %v610_v22 = vrot.slane %v419_v16, 1  ;;  %v425_v23 = vsel %vm421_vm4, %v371_v1, %v423_v12  ;;  %v858_v24 = vrot.slane %v1557_v50, 1 }
  0x28   : > { %1268 = vmatmul.mubr.msk.f32.vlgmr.msra.gmra.mrb[0].mxu1 %vm435_vm0, %v593_v2  ;;  %v608_v25 = vsel %vm587_vm7, %v606_v17, %v607_v19  ;;  %v859_v26 = vrot.slane %v425_v23, 1 }
  0x29   : > { %1300 = vmatmul.mubr.msk.f32.vlgmr.msra.gmra.mrb[0].mxu0 %vm435_vm0, %v596_v9  ;;  %1270 = vmatprep.mubr.msk.f32.mxu1 %vm435_vm0, %v596_v9  ;;  %v611_v27 = vsel %vm587_vm7, %v609_v20, %v610_v22 }
  0x2a   : > { %1302 = vmatprep.mubr.msk.f32.mxu0 %vm435_vm0, %v599_v13  ;;  %v860_v28 = vsel %vm587_vm7, %v858_v24, %v859_v26 }
  0x2c   : > { %1271 = vmatmul.mubr.msk.f32.gmra.mrb[2].mxu1 %vm435_vm0, %v599_v13 }
  0x2d   : > { %1303 = vmatmul.mubr.msk.f32.gmra.mrb[2].mxu0 %vm435_vm0, %v602_v18  ;;  %1273 = vmatprep.mubr.msk.f32.mxu1 %vm435_vm0, %v602_v18 }
  0x2e   : > { %1305 = vmatprep.mubr.msk.f32.mxu0 %vm435_vm0, %v605_v21 }
  0x30   : > { %1274 = vmatmul.mubr.msk.f32.gmra.mrb[4].mxu1 %vm435_vm0, %v605_v21 }
  0x31   : > { %1306 = vmatmul.mubr.msk.f32.gmra.mrb[4].mxu0 %vm435_vm0, %v608_v25  ;;  %1276 = vmatprep.mubr.msk.f32.mxu1 %vm435_vm0, %v608_v25 }
  0x32   : > { %1308 = vmatprep.mubr.msk.f32.mxu0 %vm435_vm0, %v611_v27 }
  0x34   : > { %1277 = vmatmul.mubr.msk.f32.gmra.mrb[6].mxu1 %vm435_vm0, %v611_v27 }
  0x35   : > { %1309 = vmatmul.mubr.msk.f32.gmra.mrb[6].mxu0 %vm435_vm0, %v860_v28  ;;  %vm1018_vm0 = vcmask 1040384  }
  0xfb   : > { %v1269_v30 = vpop.f32.mrb[0].mxu1 }
  0xfc   : > { %v1301_v31 = vpop.f32.mrb[0].mxu0  ;;  %v1327_v32 = vadd.f32 %v1269_v30, %v1178_v29  ;;  %v694_v33 = vpop.f32.mrb[1].mxu1 }
  0xfd   : > { %v929_v34 = vpop.f32.mrb[1].mxu0  ;;  %v1329_v35 = vadd.f32 %v1178_v29, %v694_v33 }
  0xfe   : > { %v1328_v36 = vadd.f32 %v1327_v32, %v1301_v31 }
  0xff   : > { %v1330_v37 = vadd.f32 %v1329_v35, %v929_v34  ;;  %v1272_v38 = vpop.f32.mrb[2].mxu1 }
 0x100   : > { %v1304_v39 = vpop.f32.mrb[2].mxu0  ;;  %977 = vst [vmem:[%s1615_s7 + $0x8] sm:$0xff] %v1328_v36  ;;  %v998_v40 = vmul.f32 %v1328_v36, %v1328_v36  ;;  %v1331_v41 = vadd.f32 %v1272_v38, %v1178_v29  ;;  %v704_v42 = vpop.f32.mrb[3].mxu1 }
 0x101   : > { %v939_v43 = vpop.f32.mrb[3].mxu0  ;;  %976 = vst [vmem:[%s1615_s7] sm:$0xff] %v1330_v37  ;;  %v984_v44 = vadd.f32 %v1330_v37, %v1328_v36  ;;  %v997_v45 = vmul.f32 %v1330_v37, %v1330_v37  ;;  %v1333_v46 = vadd.f32 %v1178_v29, %v704_v42 }
 0x102   : > { %v1332_v47 = vadd.f32 %v1331_v41, %v1304_v39 }
 0x103   : > { %v1005_v48 = vadd.f32 %v998_v40, %v997_v45  ;;  %v1334_v49 = vadd.f32 %v1333_v46, %v939_v43  ;;  %v1275_v50 = vpop.f32.mrb[4].mxu1 }
 0x104   : > { %v1307_v51 = vpop.f32.mrb[4].mxu0  ;;  %979 = vst [vmem:[%s1615_s7 + $0x18] sm:$0xff] %v1332_v47  ;;  %v1335_v52 = vadd.f32 %v1275_v50, %v1178_v29  ;;  %v714_v53 = vpop.f32.mrb[5].mxu1  ;;  %v1000_v59 = vmul.f32 %v1332_v47, %v1332_v47 }
 0x105   : > { %v949_v54 = vpop.f32.mrb[5].mxu0  ;;  %978 = vst [vmem:[%s1615_s7 + $0x10] sm:$0xff] %v1334_v49  ;;  %v985_v55 = vadd.f32 %v1334_v49, %v984_v44  ;;  %v999_v56 = vmul.f32 %v1334_v49, %v1334_v49  ;;  %v1337_v57 = vadd.f32 %v1178_v29, %v714_v53 }
 0x106   : > { %v1336_v58 = vadd.f32 %v1335_v52, %v1307_v51 }
 0x107   : > { %v1006_v60 = vadd.f32 %v1005_v48, %v999_v56  ;;  %v1338_v61 = vadd.f32 %v1337_v57, %v949_v54  ;;  %v986_v62 = vadd.f32 %v1332_v47, %v985_v55  ;;  %v1278_v63 = vpop.f32.mrb[6].mxu1 }
 0x108   : > { %v1310_v0 = vpop.f32.mrb[6].mxu0  ;;  %981 = vst [vmem:[%s1615_s7 + $0x28] sm:$0xff] %v1336_v58  ;;  %v1339_v1 = vadd.f32 %v1278_v63, %v1178_v29  ;;  %v724_v2 = vpop.f32.mrb[7].mxu1  ;;  %v1002_v9 = vmul.f32 %v1336_v58, %v1336_v58 }
 0x109   : > { %v959_v3 = vpop.f32.mrb[7].mxu0  ;;  %980 = vst [vmem:[%s1615_s7 + $0x20] sm:$0xff] %v1338_v61  ;;  %v987_v4 = vadd.f32 %v1338_v61, %v986_v62  ;;  %v1001_v5 = vmul.f32 %v1338_v61, %v1338_v61  ;;  %v1007_v6 = vadd.f32 %v1006_v60, %v1000_v59  ;;  %v1341_v7 = vadd.f32 %v1178_v29, %v724_v2 }
 0x10a   : > { %v1340_v8 = vadd.f32 %v1339_v1, %v1310_v0 }
 0x10b   : > { %v1008_v10 = vadd.f32 %v1007_v6, %v1001_v5  ;;  %v1342_v11 = vadd.f32 %v1341_v7, %v959_v3  ;;  %v988_v12 = vadd.f32 %v1336_v58, %v987_v4 }
 0x10c   : > { %983 = vst [vmem:[%s1615_s7 + $0x38] sm:$0xff] %v1340_v8  ;;  %v1004_v16 = vmul.f32 %v1340_v8, %v1340_v8 }
 0x10d   : > { %982 = vst [vmem:[%s1615_s7 + $0x30] sm:$0xff] %v1342_v11  ;;  %v989_v13 = vadd.f32 %v1342_v11, %v988_v12  ;;  %v1003_v14 = vmul.f32 %v1342_v11, %v1342_v11  ;;  %v1009_v15 = vadd.f32 %v1008_v10, %v1002_v9 }
 0x10f   : > { %v990_v17 = vadd.f32 %v1340_v8, %v989_v13  ;;  %v1010_v18 = vadd.f32 %v1009_v15, %v1003_v14 }
 0x111   : > { %v991_v19 = vrot.slane %v990_v17, 4  ;;  %v1011_v20 = vadd.f32 %v1010_v18, %v1004_v16 }
 0x113   : > { %v992_v21 = vadd.f32 %v991_v19, %v990_v17  ;;  %v1012_v22 = vrot.slane %v1011_v20, 4 }
 0x115   : > { %v993_v23 = vrot.slane %v992_v21, 2  ;;  %v1013_v24 = vadd.f32 %v1012_v22, %v1011_v20 }
 0x117   : > { %v994_v25 = vadd.f32 %v993_v23, %v992_v21  ;;  %v1014_v26 = vrot.slane %v1013_v24, 2 }
 0x119   : > { %v995_v27 = vrot.slane %v994_v25, 1  ;;  %v1015_v28 = vadd.f32 %v1014_v26, %v1013_v24 }
 0x11b   : > { %v1016_v29 = vrot.slane %v1015_v28, 1  ;;  %v996_v30 = vadd.f32 %v995_v27, %v994_v25 }
 0x11d   : > { %v1017_v31 = vadd.f32 %v1016_v29, %v1015_v28 }
 0x11f   : > { %v1019_v32 = vsel %vm1018_vm0, %v996_v30, %v1017_v31 }
 0x120   : > { %1020 = vst [vmem:[%s353_s11] sm:$0x3] %v1019_v32 }
 0x121 PF: > { %s16_s20 = sadd.s32 1, %s1408_s20   ;;  %s1644_s18 = smov %s1404_s19 }
 0x122   : > { %p13_p6 = scmp.ge.s32.totalorder %s16_s20, 4   ;;  %s1645_s19 = smov %s1647_s21 }
 0x124   :  { %15 = sbr.rel (!%p13_p6) target bundleno = 2 (0x2), region = 81 }

</bundles_post_ra>
